<compile_context>
chip_gen: v7x
topology: tpu7x:2x2x1
jax: 0.10.0
libtpu: 0.0.40
codegen_flags: <defaults>
</compile_context>

<pallas_src>
import functools
import math

import jax
import jax.numpy as jnp
from jax.experimental import pallas as pl
from jax.experimental.pallas import tpu as pltpu


def _round_up(x, m):
    return m * ((x + m - 1) // m)


def make_sinusoidal_table(num_embeddings, embedding_dim):
    """Deterministic buffer construction (mirrors the PyTorch __init__)."""
    assert embedding_dim % 2 == 0, "embedding_dim must be even"
    position = jnp.arange(num_embeddings, dtype=jnp.float32)[:, None]
    div_term = jnp.exp(
        jnp.arange(0, embedding_dim, 2, dtype=jnp.float32)
        * (-(math.log(10000.0) / embedding_dim))
    )
    angles = position * div_term  # (num_embeddings, embedding_dim // 2)
    pe = jnp.zeros((num_embeddings, embedding_dim), dtype=jnp.float32)
    pe = pe.at[:, 0::2].set(jnp.sin(angles))
    pe = pe.at[:, 1::2].set(jnp.cos(angles))
    return pe


def _gather_tile_kernel(pos_ref, col_ref, pe_ref, out_ref, *, k_steps: int):
    # pos_ref: (TM, 1)  int32  flattened positions for this row tile
    # col_ref: (1, TK)  int32  absolute table-row ids covered by this K tile
    # pe_ref : (TK, E)  f32    table slab for this K tile
    # out_ref: (TM, E)  f32    block index constant across K -> VMEM-resident acc
    one_hot = (pos_ref[...] == col_ref[...]).astype(pe_ref.dtype)      # (TM, TK)
    contrib = jnp.dot(one_hot, pe_ref[...], preferred_element_type=jnp.float32)

    if k_steps == 1:
        # Whole table in one K tile: write the result directly.
        out_ref[...] = contrib.astype(out_ref.dtype)
    else:
        @pl.when(pl.program_id(1) == 0)
        def _init():
            out_ref[...] = jnp.zeros_like(out_ref)

        out_ref[...] += contrib.astype(out_ref.dtype)


def sinusoidal_positional_embedding(positions, pe, *, block_rows=None,
                                    table_block_rows=None):
    """Equivalent of SinusoidalPositionalEmbedding.forward(positions)."""
    num_emb, emb_dim = pe.shape
    flat = positions.reshape(-1).astype(jnp.int32)
    n = int(flat.shape[0])

    # --- row-tile size TM (tunable; sweep e.g. 512/1024/2048 per generation) ---
    if block_rows is None:
        tm = ((1 << 20) // (emb_dim * 4)) // 128 * 128   # ~1 MiB of output/step
        tm = max(128, min(2048, tm))
    else:
        tm = _round_up(block_rows, 8)
    tm = min(tm, _round_up(max(n, 1), 8))                # don't over-pad tiny inputs
    n_pad = _round_up(max(n, 1), tm)
    m_steps = n_pad // tm

    # --- table-tile size TK -----------------------------------------------------
    num_emb8 = _round_up(num_emb, 8)
    if table_block_rows is not None:
        tk = _round_up(table_block_rows, 8)
        if tk < num_emb8:
            tk = _round_up(tk, 128)      # lane-dim legality of the col-id tile
    else:
        # Bound the (TM, TK) one-hot temporaries (~4 MiB) and the double-buffered
        # (TK, emb_dim) table blocks (~4 MiB); keep the whole table resident
        # (K grid == 1) whenever it already fits under those caps.
        tk_cap = min((1 << 20) // tm, (2 << 20) // (emb_dim * 4))
        tk_cap = max(128, (tk_cap // 128) * 128)
        tk = num_emb8 if num_emb8 <= tk_cap else tk_cap
    num_emb_pad = _round_up(num_emb, tk)
    k_steps = num_emb_pad // tk

    # --- padded operands ----------------------------------------------------------
    # Padding index 0 is always valid; the padded tail rows are sliced off below.
    flat_padded = jnp.zeros((n_pad, 1), dtype=jnp.int32).at[:n, 0].set(flat)
    # Column ids hoisted out of the kernel: per-K-tile absolute table-row ids.
    col_ids = jnp.arange(num_emb_pad, dtype=jnp.int32).reshape(1, num_emb_pad)
    pe_padded = (pe if num_emb_pad == num_emb
                 else jnp.pad(pe, ((0, num_emb_pad - num_emb), (0, 0))))

    # --- VMEM budget / cost hints ---------------------------------------------------
    emb_dim_p = _round_up(emb_dim, 128)
    tk_lane_p = _round_up(tk, 128)
    vmem_est = 4 * (
        2 * tm * 128            # pos blocks (lane-padded to 128), double-buffered
        + 2 * 8 * tk_lane_p     # col-id blocks (sublane-padded to 8)
        + 2 * tk * emb_dim_p    # table blocks
        + 2 * tm * emb_dim_p    # output blocks
        + 3 * tm * tk           # one-hot / compare temporaries
    )
    vmem_limit = int(min(max(vmem_est + (4 << 20), 32 << 20), 48 << 20))

    cost = pl.CostEstimate(
        flops=2 * n_pad * num_emb_pad * emb_dim,
        transcendentals=0,
        bytes_accessed=4 * (n_pad * emb_dim + num_emb_pad * emb_dim
                            + n_pad + num_emb_pad),
    )

    kernel = functools.partial(_gather_tile_kernel, k_steps=k_steps)

    out_flat = pl.pallas_call(
        kernel,
        out_shape=jax.ShapeDtypeStruct((n_pad, emb_dim), pe.dtype),
        grid_spec=pltpu.PrefetchScalarGridSpec(
            num_scalar_prefetch=0,
            grid=(m_steps, k_steps),                     # reduction (K) axis last
            in_specs=[
                # (TM, 1) position tile: sublane dim mult-of-8, lane dim 1 == full.
                pl.BlockSpec((tm, 1), lambda i, k: (i, 0)),
                # (1, TK) absolute column ids for this K tile.
                pl.BlockSpec((1, tk), lambda i, k: (0, k)),
                # (TK, emb_dim) table slab for this K tile (full table when K==1).
                pl.BlockSpec((tk, emb_dim), lambda i, k: (k, 0)),
            ],
            # Dense (TM, emb_dim) output tile; constant across K -> VMEM-resident
            # accumulator, written back to HBM once per row tile.
            out_specs=pl.BlockSpec((tm, emb_dim), lambda i, k: (i, 0)),
        ),
        compiler_params=pltpu.CompilerParams(
            dimension_semantics=("parallel", "arbitrary"),
            vmem_limit_bytes=vmem_limit,
        ),
        cost_estimate=cost,
    )(flat_padded, col_ids, pe_padded)

    return out_flat[:n].reshape((*positions.shape, emb_dim))


if __name__ == "__main__":
    key = jax.random.PRNGKey(0)

    # --- Test 1: small table, fully VMEM-resident (K grid == 1) -----------------
    embedding_dim = 128
    num_embeddings = 64
    pe = make_sinusoidal_table(num_embeddings, embedding_dim)
    positions = jax.random.randint(key, shape=(2, 8), minval=0,
                                   maxval=num_embeddings, dtype=jnp.int32)
    out = jax.block_until_ready(sinusoidal_positional_embedding(positions, pe))
    ref = pe[positions.reshape(-1)].reshape((*positions.shape, embedding_dim))
    assert out.shape == (2, 8, embedding_dim), out.shape
    assert out.dtype == jnp.float32
    assert jnp.allclose(out, ref, atol=1e-6), "mismatch vs reference gather (test 1)"

    # --- Test 2: forced K-tiling of the table (exercises the accumulator path) --
    embedding_dim2 = 64
    num_embeddings2 = 256
    pe2 = make_sinusoidal_table(num_embeddings2, embedding_dim2)
    positions2 = jax.random.randint(jax.random.PRNGKey(0), shape=(3, 5), minval=0,
                                    maxval=num_embeddings2, dtype=jnp.int32)
    out2 = jax.block_until_ready(
        sinusoidal_positional_embedding(positions2, pe2, table_block_rows=128))
    ref2 = pe2[positions2.reshape(-1)].reshape((*positions2.shape, embedding_dim2))
    assert out2.shape == (3, 5, embedding_dim2), out2.shape
    assert jnp.allclose(out2, ref2, atol=1e-6), "mismatch vs reference gather (test 2)"

    print("KERNEL_OK")
</pallas_src>

<mosaic_0001>
module attributes {stable_mosaic.version = 11 : i64} {
  func.func @_gather_tile_kernel(%arg0: i32, %arg1: i32, %arg2: memref<16x1xi32, #tpu.memory_space<vmem>>, %arg3: memref<1x64xi32, #tpu.memory_space<vmem>>, %arg4: memref<64x128xf32, #tpu.memory_space<vmem>>, %arg5: memref<16x128xf32, #tpu.memory_space<vmem>>) attributes {dimension_semantics = [#tpu.dimension_semantics<parallel>, #tpu.dimension_semantics<arbitrary>], iteration_bounds = array<i64: 1, 1>, scalar_prefetch = 0 : i64, scratch_operands = 0 : i64, tpu.core_type = #tpu.core_type<tc>, window_params = [{transform_indices = @transform_0, window_bounds = array<i64: 16, 1>}, {transform_indices = @transform_1, window_bounds = array<i64: 1, 64>}, {transform_indices = @transform_2, window_bounds = array<i64: 64, 128>}, {transform_indices = @transform_3, window_bounds = array<i64: 16, 128>}]} {
    %c0 = arith.constant 0 : index
    %c0_0 = arith.constant 0 : index
    %0 = vector.load %arg2[%c0, %c0_0] : memref<16x1xi32, #tpu.memory_space<vmem>>, vector<16x1xi32>
    %c0_1 = arith.constant 0 : index
    %c0_2 = arith.constant 0 : index
    %1 = vector.load %arg3[%c0_1, %c0_2] : memref<1x64xi32, #tpu.memory_space<vmem>>, vector<1x64xi32>
    %2 = vector.broadcast %0 : vector<16x1xi32> to vector<16x64xi32>
    %3 = vector.broadcast %1 : vector<1x64xi32> to vector<16x64xi32>
    %4 = arith.cmpi eq, %2, %3 : vector<16x64xi32>
    %5 = arith.extui %4 : vector<16x64xi1> to vector<16x64xi32>
    %6 = arith.sitofp %5 : vector<16x64xi32> to vector<16x64xf32>
    %c0_3 = arith.constant 0 : index
    %c0_4 = arith.constant 0 : index
    %7 = vector.load %arg4[%c0_3, %c0_4] : memref<64x128xf32, #tpu.memory_space<vmem>>, vector<64x128xf32>
    %cst = arith.constant dense<0.000000e+00> : vector<16x128xf32>
    %8 = tpu.matmul %6, %7, %cst {dimension_numbers = #tpu.dot_dimension_numbers<[1], [0], [0], [1], [0, 0, 1, 1], [], []>} : vector<16x64xf32>, vector<64x128xf32>, vector<16x128xf32> -> vector<16x128xf32>
    %c0_5 = arith.constant 0 : index
    %c0_6 = arith.constant 0 : index
    %9 = vector.load %arg5[%c0_5, %c0_6] : memref<16x128xf32, #tpu.memory_space<vmem>>, vector<16x128xf32>
    tpu.vector_store %arg5[%c0_5, %c0_6], %8 {strides = array<i32>} : memref<16x128xf32, #tpu.memory_space<vmem>>, vector<16x128xf32>,
    return
  }
  func.func @transform_0(%arg0: i32, %arg1: i32) -> (i32, i32) {
    %c0_i32 = arith.constant 0 : i32
    %c0_i32_0 = arith.constant 0 : i32
    return %arg0, %c0_i32 : i32, i32
  }
  func.func @transform_1(%arg0: i32, %arg1: i32) -> (i32, i32) {
    %c0_i32 = arith.constant 0 : i32
    %c0_i32_0 = arith.constant 0 : i32
    return %c0_i32, %arg1 : i32, i32
  }
  func.func @transform_2(%arg0: i32, %arg1: i32) -> (i32, i32) {
    %c0_i32 = arith.constant 0 : i32
    %c0_i32_0 = arith.constant 0 : i32
    return %arg1, %c0_i32 : i32, i32
  }
  func.func @transform_3(%arg0: i32, %arg1: i32) -> (i32, i32) {
    %c0_i32 = arith.constant 0 : i32
    %c0_i32_0 = arith.constant 0 : i32
    return %arg0, %c0_i32 : i32, i32
  }
}

</mosaic_0001>

<bundles_post_ra>
// kernel: tpu_custom_call.1
= control target key start
LH: loop header
LB: loop body
LE: loop exit
PB: predicated region body
PF: predicated region fallthrough
CT: control target
= control target key end

     0   :  { %8 = vsyncpa [#allocation3], 0  ;;  %s327_s0 = inlined_call_operand.vmem [shape: s32[16,1], index: 0, kind: input, shape index: {}]   ;;  %s328_s1 = inlined_call_operand.vmem [shape: s32[1,64], index: 1, kind: input, shape index: {}]   ;;  %s329_s2 = inlined_call_operand.hbm [shape: f32[64,128], index: 2, kind: input, shape index: {}]   ;;  %s330_s3 = inlined_call_operand.hbm [shape: f32[16,128], index: 3, kind: output, shape index: {}]  }
   0x1   :  { %9 = vsyncpa [#allocation4], 0  ;;  %s262_s12 = smov [#allocation2]   ;;  %s214_s16 = scalar_lea.hbm %s329_s2, 1024 }
   0x2   :  { %s19_s13 = sshll.u32 %s262_s12, 4  ;;  %p215_p0 = scmp.ne.s32.totalorder %s329_s2, %s214_s16  ;;  %s20_s13 = int_to_ptr.vmem [resolvable:$true] %s19_s13 }
   0x3   :  { %p218_p1 = scmp.lt.u32.totalorder %s214_s16, %s329_s2 }
   0x5   :  { %p220_p2 = pnand %p218_p1, %p215_p0 }
   0x7   :  { %223 = shalt.err (!%p220_p2)
}
   0x8   :  { %s224_s21 = scalar_lea.vmem %s20_s13, 1024  ;;  %p229_p4 = scmp.lt.s32.totalorder %s20_s13, %s20_s13 }
   0x9   :  { %p225_p3 = scmp.ne.s32.totalorder %s20_s13, %s224_s21  ;;  %p230_p5 = scmp.lt.s32.totalorder %s224_s21, %s224_s21 }
   0xb   :  { %p231_p6 = por %p230_p5, %p229_p4 }
   0xd   :  { %p232_p7 = pnand %p231_p6, %p225_p3 }
   0xf   :  { %235 = shalt.err (!%p232_p7)
}
  0x10   :  { %s263_s22 = smov 128   ;;  %s264_s23 = smov 8  }
  0x11   :  { %25 = dma.hbm_to_vmem [thread:$0]  %s329_s2, 1024, %s20_s13, [#allocation3], %s263_s22, %s263_s22, %s264_s23  }
  0x12   :  { %258 = dma.done.wait [#allocation3], 1024  }
  0x13   :  { %259 = vsyncadd [#allocation3], 4294966272  ;;  %v265_v0 = vmov 0   ;;  %v29_v1 = vld [vmem:[%s327_s0] sm:$0xff]  ;;  %v48_v2 = vld [vmem:[#allocation2] sm:$0xff]  ;;  %vm56_vm0 = vcmask 523264  }
  0x14   :  { %213 = vset.pattern.permute.xlu0 %v265_v0  ;;  %v49_v3 = vld [vmem:[#allocation2 + $0x8] sm:$0xff]  ;;  %v50_v4 = vld [vmem:[#allocation2 + $0x10] sm:$0xff]  ;;  %v51_v5 = vld [vmem:[#allocation2 + $0x18] sm:$0xff]  ;;  %v266_v17 = vmov 0.0  }
  0x15   :  { %33 = vperm.xlu0 %213, %v29_v1   ;;  %v30_v6 = vld [vmem:[%s327_s0 + $0x8] sm:$0xff]  ;;  %v191_v7 = vpack.c.bf16 %v49_v3, %v48_v2  ;;  %v195_v8 = vpack.c.bf16 %v51_v5, %v50_v4  ;;  %v52_v9 = vld [vmem:[#allocation2 + $0x20] sm:$0xff]  ;;  %v53_v10 = vld [vmem:[#allocation2 + $0x28] sm:$0xff]  ;;  %s267_s0 = smov [#allocation5]  }
  0x16   :  { %v199_v11 = vpack.c.bf16 %v53_v10, %v52_v9  ;;  %v54_v12 = vld [vmem:[#allocation2 + $0x30] sm:$0xff]  ;;  %v55_v13 = vld [vmem:[#allocation2 + $0x38] sm:$0xff]  ;;  %v157_v15 = vld [vmem:[%s328_s1] ss:$0 sm:$0xff]  ;;  %s145_s4 = sshll.u32 %s267_s0, 4  ;;  %s146_s4 = int_to_ptr.vmem [resolvable:$true] %s145_s4 }
  0x17   :  { %192 = vmatprep.subr.bf16.mxu0 %v191_v7  ;;  %v203_v14 = vpack.c.bf16 %v55_v13, %v54_v12  ;;  %s236_s5 = scalar_lea.vmem %s146_s4, 256  ;;  %p241_p9 = scmp.lt.s32.totalorder %s146_s4, %s146_s4 }
  0x18   :  { %194 = vmatpush3.bf16.msra.mxu0 %v191_v7  ;;  %p237_p8 = scmp.ne.s32.totalorder %s146_s4, %s236_s5  ;;  %p242_p10 = scmp.lt.s32.totalorder %s236_s5, %s236_s5 }
  0x19   :  { %36 = vperm.xlu0 %213, %v30_v6   ;;  %196 = vmatprep.subr.bf16.mxu0 %v195_v8 }
  0x1a   :  { %p243_p11 = por %p242_p10, %p241_p9 }
  0x1c   :  { %198 = vmatpush3.bf16.msra.mxu0 %v195_v8  ;;  %p244_p12 = pnand %p243_p11, %p237_p8 }
  0x1d   :  { %200 = vmatprep.subr.bf16.mxu0 %v199_v11 }
  0x20   :  { %202 = vmatpush3.bf16.msra.mxu0 %v199_v11 }
  0x21   :  { %204 = vmatprep.subr.bf16.mxu0 %v203_v14 }
  0x24   :  { %206 = vmatpush3.bf16.msra.mxu0 %v203_v14 }
  0x94   :  { %v34_v16 = vpop.permute.xlu0 %33 }
  0x95   :  { %vm42_vm1 = vcmp.eq.s32.totalorder %v34_v16, %v157_v15 }
  0x96   :  { %v158_v18 = vsel %vm42_vm1, 1.0, %v266_v17 }
  0x97   :  { %188 = vmatprep.mubr.msk.f32.mxu0 %vm56_vm0, %v158_v18 }
  0x98   :  { %v37_v19 = vpop.permute.xlu0 %36 }
  0x99   :  { %vm43_vm2 = vcmp.eq.s32.totalorder %v37_v19, %v157_v15 }
  0x9a   :  { %v159_v20 = vsel %vm43_vm2, 1.0, %v266_v17 }
  0x9b   :  { %189 = vmatmul.mubr.msk.f32.vlgmr.msra.gmra.mrb[0].mxu0 %vm56_vm0, %v159_v20 }
 0x16e   :  { %v190_v21 = vpop.f32.mrb[0].mxu0 }
 0x16f   :  { %139 = vst [vmem:[#allocation5 + $0x8] sm:$0xff] %v190_v21  ;;  %v129_v22 = vpop.f32.mrb[1].mxu0 }
 0x170   :  { %138 = vst [vmem:[#allocation5] sm:$0xff] %v129_v22 }
 0x171   :  { %247 = shalt.err (!%p244_p12)
}
 0x172   :  { %s248_s7 = scalar_lea.hbm %s330_s3, 256 }
 0x173   :  { %p249_p13 = scmp.ne.s32.totalorder %s330_s3, %s248_s7  ;;  %p252_p0 = scmp.lt.u32.totalorder %s248_s7, %s330_s3 }
 0x175   :  { %p254_p1 = pnand %p252_p0, %p249_p13 }
 0x177   :  { %257 = shalt.err (!%p254_p1)
}
 0x178   :  { %151 = dma.vmem_to_hbm [thread:$0]  %s146_s4, 256, %s330_s3, [#allocation4], %s263_s22, %s263_s22, %s264_s23  }
 0x179   :  { %260 = dma.done.wait [#allocation4], 256  }
 0x17a   :  { %261 = vsyncadd [#allocation4], 4294967040 }
 0x17b   :  { %155 = vsyncpa [#allocation3], 1 }
 0x17c   :  { %156 = vsyncpa [#allocation4], 1 }

</bundles_post_ra>
